<compile_context>
chip_gen: v6e
topology: v6e:2x2x1
jax: 0.10.0
libtpu: 0.0.40
codegen_flags: <defaults>
</compile_context>

<pallas_src>
import jax
import jax.numpy as jnp
from jax.experimental import pallas as pl
from jax.experimental.pallas import tpu as pltpu


def _round_up(x, m):
    return (x + m - 1) // m * m


def _leaky_relu(x, slope=0.2):
    return jnp.where(x > 0, x, slope * x)


def generator_kernel(z_ref, onehot_ref, clsw_ref,
                     w1_ref, w2_ref, w3_ref, w4_ref,
                     bias_ref, out_ref):
    # Layer 1: concat([z, emb(labels)]) @ W1 + b1  rewritten as
    #   z_pad @ W1z_pad  +  onehot_pad @ (emb @ W1c + b1)
    # (embedding + bias folded into the (8,128) class weight in the wrapper).
    h = (jnp.dot(z_ref[...], w1_ref[...], preferred_element_type=jnp.float32)
         + jnp.dot(onehot_ref[...], clsw_ref[...], preferred_element_type=jnp.float32))
    h = _leaky_relu(h)
    # TODO(synk): nn.Dropout(0.5) is identity in eval mode; training-mode random mask omitted.

    h = jnp.dot(h.astype(jnp.bfloat16), w2_ref[...],
                preferred_element_type=jnp.float32) + bias_ref[:, 0:256]
    h = _leaky_relu(h)

    h = jnp.dot(h.astype(jnp.bfloat16), w3_ref[...],
                preferred_element_type=jnp.float32) + bias_ref[:, 256:768]
    h = _leaky_relu(h)

    h = jnp.dot(h.astype(jnp.bfloat16), w4_ref[...],
                preferred_element_type=jnp.float32) + bias_ref[:, 768:1280]
    out_ref[...] = jnp.tanh(h)


def init_params(key):
    """Deterministic parameter init mimicking PyTorch defaults.

    Linear: U(-1/sqrt(fan_in), 1/sqrt(fan_in)) for W and b; Embedding: N(0, 1).
    Weights stored as (in_features, out_features), f32 (cast to bf16 at call time).
    """
    ks = jax.random.split(key, 9)
    dims = [(110, 128), (128, 256), (256, 512), (512, 400)]
    params = {"emb": jax.random.normal(ks[0], (4, 10), dtype=jnp.float32)}
    for i, (fin, fout) in enumerate(dims, start=1):
        bound = 1.0 / (fin ** 0.5)
        params[f"w{i}"] = jax.random.uniform(
            ks[2 * i - 1], (fin, fout), minval=-bound, maxval=bound, dtype=jnp.float32)
        params[f"b{i}"] = jax.random.uniform(
            ks[2 * i], (1, fout), minval=-bound, maxval=bound, dtype=jnp.float32)
    return params


def generator_forward(z, labels, params, batch_tile=256):
    # batch_tile: 256 amortizes per-step overhead on v6e/v7x; use 128 on v5e
    # (its 4x128x128 MXU saturates at M=128).
    B, K = z.shape
    f32, bf16 = jnp.float32, jnp.bfloat16

    # --- wrapper-side prep (layout plumbing, not compute-hoisting) ----------
    # Fold embedding + b1 into a class weight for layer 1, pad classes 4 -> 8.
    w1 = params["w1"]                                      # (110, 128)
    w1z, w1c = w1[:100, :], w1[100:, :]                    # split matches concat([z, c]) order
    class_w = params["emb"] @ w1c + params["b1"]           # (4, 128) f32
    class_w = jnp.pad(class_w, ((0, 4), (0, 0)))           # (8, 128) f32

    # Pad z's K (100 -> 128) and W1z rows to match; zero rows contribute nothing.
    w1z_pad = jnp.pad(w1z, ((0, 128 - 100), (0, 0))).astype(bf16)          # (128, 128)

    # Pad last layer to a lane-dense 512-wide output (slice back to 400 outside).
    w4_pad = jnp.pad(params["w4"], ((0, 0), (0, 112))).astype(bf16)        # (512, 512)
    b4_pad = jnp.pad(params["b4"], ((0, 0), (0, 112)))                     # (1, 512)

    w2 = params["w2"].astype(bf16)                                         # (128, 256)
    w3 = params["w3"].astype(bf16)                                         # (256, 512)
    biases = jnp.concatenate(
        [params["b2"], params["b3"], b4_pad], axis=1).astype(f32)          # (1, 1280)

    # Batch tiling / padding.
    TB = min(batch_tile, _round_up(B, 8))
    Bp = _round_up(B, TB)
    z_pad = jnp.pad(z, ((0, Bp - B), (0, 128 - K))).astype(bf16)           # (Bp, 128)
    onehot = jax.nn.one_hot(labels, 4, dtype=f32)
    onehot = jnp.pad(onehot, ((0, Bp - B), (0, 4)))                        # (Bp, 8)

    # --- pallas call --------------------------------------------------------
    batch_spec = lambda cols: pl.BlockSpec((TB, cols), lambda i: (i, 0))
    const_spec = lambda shape: pl.BlockSpec(shape, lambda i: (0, 0))       # weight stays resident

    out = pl.pallas_call(
        generator_kernel,
        out_shape=jax.ShapeDtypeStruct((Bp, 512), f32),
        grid=(Bp // TB,),
        in_specs=[
            batch_spec(128),              # z (padded)
            batch_spec(8),                # one-hot labels (padded)
            const_spec((8, 128)),         # class weight (emb @ W1c + b1)
            const_spec((128, 128)),       # W1z (padded)
            const_spec((128, 256)),       # W2
            const_spec((256, 512)),       # W3
            const_spec((512, 512)),       # W4 (padded)
            const_spec((1, 1280)),        # packed b2|b3|b4_pad
        ],
        out_specs=batch_spec(512),
        compiler_params=pltpu.CompilerParams(
            dimension_semantics=("parallel",)),
    )(z_pad, onehot, class_w, w1z_pad, w2, w3, w4_pad, biases)

    return jnp.squeeze(out[:B, :400])                      # matches torch .squeeze()


def reference_forward(z, labels, params):
    """Pure-JAX reference with the same bf16-weight / f32-accumulate precision."""
    f32, bf16 = jnp.float32, jnp.bfloat16
    w1 = params["w1"]
    w1z, w1c = w1[:100, :], w1[100:, :]
    cls_w = params["emb"] @ w1c + params["b1"]
    onehot = jax.nn.one_hot(labels, 4, dtype=f32)
    h = (jnp.dot(z.astype(bf16), w1z.astype(bf16), preferred_element_type=f32)
         + onehot @ cls_w)
    h = _leaky_relu(h)
    h = jnp.dot(h.astype(bf16), params["w2"].astype(bf16),
                preferred_element_type=f32) + params["b2"]
    h = _leaky_relu(h)
    h = jnp.dot(h.astype(bf16), params["w3"].astype(bf16),
                preferred_element_type=f32) + params["b3"]
    h = _leaky_relu(h)
    h = jnp.dot(h.astype(bf16), params["w4"].astype(bf16),
                preferred_element_type=f32) + params["b4"]
    return jnp.squeeze(jnp.tanh(h))


if __name__ == "__main__":
    key = jax.random.PRNGKey(0)
    k_params, k_z, k_lbl = jax.random.split(key, 3)

    params = init_params(k_params)

    B = 8
    z = jax.random.normal(k_z, (B, 100), dtype=jnp.float32)          # latent noise
    labels = jax.random.randint(k_lbl, (B,), 0, 4, dtype=jnp.int32)  # class labels in [0, 4)

    out = generator_forward(z, labels, params)
    jax.block_until_ready(out)

    ref = reference_forward(z, labels, params)

    assert out.shape == (B, 400), out.shape
    assert bool(jnp.all(jnp.isfinite(out)))
    assert bool(jnp.all(jnp.abs(out) <= 1.0 + 1e-6))                 # tanh output range
    assert bool(jnp.allclose(out, ref, atol=1e-2, rtol=1e-2))
    print("KERNEL_OK")
</pallas_src>

<mosaic_0001>
module attributes {stable_mosaic.version = 11 : i64} {
  func.func @generator_kernel(%arg0: i32, %arg1: memref<8x128xbf16, #tpu.memory_space<vmem>>, %arg2: memref<8x8xf32, #tpu.memory_space<vmem>>, %arg3: memref<8x128xf32, #tpu.memory_space<vmem>>, %arg4: memref<128x128xbf16, #tpu.memory_space<vmem>>, %arg5: memref<128x256xbf16, #tpu.memory_space<vmem>>, %arg6: memref<256x512xbf16, #tpu.memory_space<vmem>>, %arg7: memref<512x512xbf16, #tpu.memory_space<vmem>>, %arg8: memref<1x1280xf32, #tpu.memory_space<vmem>>, %arg9: memref<8x512xf32, #tpu.memory_space<vmem>>) attributes {dimension_semantics = [#tpu.dimension_semantics<parallel>], iteration_bounds = array<i64: 1>, scalar_prefetch = 0 : i64, scratch_operands = 0 : i64, tpu.core_type = #tpu.core_type<tc>, window_params = [{transform_indices = @transform_0, window_bounds = array<i64: 8, 128>}, {transform_indices = @transform_1, window_bounds = array<i64: 8, 8>}, {pipeline_mode = #tpu.pipeline_mode<synchronous>, transform_indices = @transform_2, window_bounds = array<i64: 8, 128>}, {pipeline_mode = #tpu.pipeline_mode<synchronous>, transform_indices = @transform_3, window_bounds = array<i64: 128, 128>}, {pipeline_mode = #tpu.pipeline_mode<synchronous>, transform_indices = @transform_4, window_bounds = array<i64: 128, 256>}, {pipeline_mode = #tpu.pipeline_mode<synchronous>, transform_indices = @transform_5, window_bounds = array<i64: 256, 512>}, {pipeline_mode = #tpu.pipeline_mode<synchronous>, transform_indices = @transform_6, window_bounds = array<i64: 512, 512>}, {pipeline_mode = #tpu.pipeline_mode<synchronous>, transform_indices = @transform_7, window_bounds = array<i64: 1, 1280>}, {transform_indices = @transform_8, window_bounds = array<i64: 8, 512>}]} {
    %c0 = arith.constant 0 : index
    %c0_0 = arith.constant 0 : index
    %0 = vector.load %arg1[%c0, %c0_0] : memref<8x128xbf16, #tpu.memory_space<vmem>>, vector<8x128xbf16>
    %c0_1 = arith.constant 0 : index
    %c0_2 = arith.constant 0 : index
    %1 = vector.load %arg4[%c0_1, %c0_2] : memref<128x128xbf16, #tpu.memory_space<vmem>>, vector<128x128xbf16>
    %cst = arith.constant dense<0.000000e+00> : vector<8x128xf32>
    %2 = tpu.matmul %0, %1, %cst {dimension_numbers = #tpu.dot_dimension_numbers<[1], [0], [0], [1], [0, 0, 1, 1], [], []>} : vector<8x128xbf16>, vector<128x128xbf16>, vector<8x128xf32> -> vector<8x128xf32>
    %c0_3 = arith.constant 0 : index
    %c0_4 = arith.constant 0 : index
    %3 = vector.load %arg2[%c0_3, %c0_4] : memref<8x8xf32, #tpu.memory_space<vmem>>, vector<8x8xf32>
    %c0_5 = arith.constant 0 : index
    %c0_6 = arith.constant 0 : index
    %4 = vector.load %arg3[%c0_5, %c0_6] : memref<8x128xf32, #tpu.memory_space<vmem>>, vector<8x128xf32>
    %cst_7 = arith.constant dense<0.000000e+00> : vector<8x128xf32>
    %5 = tpu.matmul %3, %4, %cst_7 {dimension_numbers = #tpu.dot_dimension_numbers<[1], [0], [0], [1], [0, 0, 1, 1], [], []>} : vector<8x8xf32>, vector<8x128xf32>, vector<8x128xf32> -> vector<8x128xf32>
    %6 = arith.addf %2, %5 : vector<8x128xf32>
    %cst_8 = arith.constant 0.000000e+00 : f32
    %7 = vector.broadcast %cst_8 : f32 to vector<8x128xf32>
    %8 = arith.cmpf ogt, %6, %7 : vector<8x128xf32>
    %cst_9 = arith.constant 2.000000e-01 : f32
    %9 = vector.broadcast %cst_9 : f32 to vector<8x128xf32>
    %10 = arith.mulf %9, %6 : vector<8x128xf32>
    %11 = arith.select %8, %6, %10 : vector<8x128xi1>, vector<8x128xf32>
    %12 = arith.truncf %11 : vector<8x128xf32> to vector<8x128xbf16>
    %c0_10 = arith.constant 0 : index
    %c0_11 = arith.constant 0 : index
    %13 = vector.load %arg5[%c0_10, %c0_11] : memref<128x256xbf16, #tpu.memory_space<vmem>>, vector<128x256xbf16>
    %cst_12 = arith.constant dense<0.000000e+00> : vector<8x256xf32>
    %14 = tpu.matmul %12, %13, %cst_12 {dimension_numbers = #tpu.dot_dimension_numbers<[1], [0], [0], [1], [0, 0, 1, 1], [], []>} : vector<8x128xbf16>, vector<128x256xbf16>, vector<8x256xf32> -> vector<8x256xf32>
    %c0_13 = arith.constant 0 : index
    %c0_14 = arith.constant 0 : index
    %15 = vector.load %arg8[%c0_13, %c0_14] : memref<1x1280xf32, #tpu.memory_space<vmem>>, vector<1x256xf32>
    %16 = vector.broadcast %15 : vector<1x256xf32> to vector<8x256xf32>
    %17 = arith.addf %14, %16 : vector<8x256xf32>
    %cst_15 = arith.constant 0.000000e+00 : f32
    %18 = vector.broadcast %cst_15 : f32 to vector<8x256xf32>
    %19 = arith.cmpf ogt, %17, %18 : vector<8x256xf32>
    %cst_16 = arith.constant 2.000000e-01 : f32
    %20 = vector.broadcast %cst_16 : f32 to vector<8x256xf32>
    %21 = arith.mulf %20, %17 : vector<8x256xf32>
    %22 = arith.select %19, %17, %21 : vector<8x256xi1>, vector<8x256xf32>
    %23 = arith.truncf %22 : vector<8x256xf32> to vector<8x256xbf16>
    %c0_17 = arith.constant 0 : index
    %c0_18 = arith.constant 0 : index
    %24 = vector.load %arg6[%c0_17, %c0_18] : memref<256x512xbf16, #tpu.memory_space<vmem>>, vector<256x512xbf16>
    %cst_19 = arith.constant dense<0.000000e+00> : vector<8x512xf32>
    %25 = tpu.matmul %23, %24, %cst_19 {dimension_numbers = #tpu.dot_dimension_numbers<[1], [0], [0], [1], [0, 0, 1, 1], [], []>} : vector<8x256xbf16>, vector<256x512xbf16>, vector<8x512xf32> -> vector<8x512xf32>
    %c0_20 = arith.constant 0 : index
    %c256 = arith.constant 256 : index
    %26 = vector.load %arg8[%c0_20, %c256] : memref<1x1280xf32, #tpu.memory_space<vmem>>, vector<1x512xf32>
    %27 = vector.broadcast %26 : vector<1x512xf32> to vector<8x512xf32>
    %28 = arith.addf %25, %27 : vector<8x512xf32>
    %cst_21 = arith.constant 0.000000e+00 : f32
    %29 = vector.broadcast %cst_21 : f32 to vector<8x512xf32>
    %30 = arith.cmpf ogt, %28, %29 : vector<8x512xf32>
    %cst_22 = arith.constant 2.000000e-01 : f32
    %31 = vector.broadcast %cst_22 : f32 to vector<8x512xf32>
    %32 = arith.mulf %31, %28 : vector<8x512xf32>
    %33 = arith.select %30, %28, %32 : vector<8x512xi1>, vector<8x512xf32>
    %34 = arith.truncf %33 : vector<8x512xf32> to vector<8x512xbf16>
    %c0_23 = arith.constant 0 : index
    %c0_24 = arith.constant 0 : index
    %35 = vector.load %arg7[%c0_23, %c0_24] : memref<512x512xbf16, #tpu.memory_space<vmem>>, vector<512x512xbf16>
    %cst_25 = arith.constant dense<0.000000e+00> : vector<8x512xf32>
    %36 = tpu.matmul %34, %35, %cst_25 {dimension_numbers = #tpu.dot_dimension_numbers<[1], [0], [0], [1], [0, 0, 1, 1], [], []>} : vector<8x512xbf16>, vector<512x512xbf16>, vector<8x512xf32> -> vector<8x512xf32>
    %c0_26 = arith.constant 0 : index
    %c768 = arith.constant 768 : index
    %37 = vector.load %arg8[%c0_26, %c768] : memref<1x1280xf32, #tpu.memory_space<vmem>>, vector<1x512xf32>
    %38 = vector.broadcast %37 : vector<1x512xf32> to vector<8x512xf32>
    %39 = arith.addf %36, %38 : vector<8x512xf32>
    %40 = math.tanh %39 : vector<8x512xf32>
    %c0_27 = arith.constant 0 : index
    %c0_28 = arith.constant 0 : index
    %41 = vector.load %arg9[%c0_27, %c0_28] : memref<8x512xf32, #tpu.memory_space<vmem>>, vector<8x512xf32>
    tpu.vector_store %arg9[%c0_27, %c0_28], %40 {strides = array<i32>} : memref<8x512xf32, #tpu.memory_space<vmem>>, vector<8x512xf32>,
    return
  }
  func.func @transform_0(%arg0: i32) -> (i32, i32) {
    %c0_i32 = arith.constant 0 : i32
    %c0_i32_0 = arith.constant 0 : i32
    return %arg0, %c0_i32 : i32, i32
  }
  func.func @transform_1(%arg0: i32) -> (i32, i32) {
    %c0_i32 = arith.constant 0 : i32
    %c0_i32_0 = arith.constant 0 : i32
    return %arg0, %c0_i32 : i32, i32
  }
  func.func @transform_2(%arg0: i32) -> (i32, i32) {
    %c0_i32 = arith.constant 0 : i32
    %c0_i32_0 = arith.constant 0 : i32
    %c0_i32_1 = arith.constant 0 : i32
    return %c0_i32, %c0_i32_0 : i32, i32
  }
  func.func @transform_3(%arg0: i32) -> (i32, i32) {
    %c0_i32 = arith.constant 0 : i32
    %c0_i32_0 = arith.constant 0 : i32
    %c0_i32_1 = arith.constant 0 : i32
    return %c0_i32, %c0_i32_0 : i32, i32
  }
  func.func @transform_4(%arg0: i32) -> (i32, i32) {
    %c0_i32 = arith.constant 0 : i32
    %c0_i32_0 = arith.constant 0 : i32
    %c0_i32_1 = arith.constant 0 : i32
    return %c0_i32, %c0_i32_0 : i32, i32
  }
  func.func @transform_5(%arg0: i32) -> (i32, i32) {
    %c0_i32 = arith.constant 0 : i32
    %c0_i32_0 = arith.constant 0 : i32
    %c0_i32_1 = arith.constant 0 : i32
    return %c0_i32, %c0_i32_0 : i32, i32
  }
  func.func @transform_6(%arg0: i32) -> (i32, i32) {
    %c0_i32 = arith.constant 0 : i32
    %c0_i32_0 = arith.constant 0 : i32
    %c0_i32_1 = arith.constant 0 : i32
    return %c0_i32, %c0_i32_0 : i32, i32
  }
  func.func @transform_7(%arg0: i32) -> (i32, i32) {
    %c0_i32 = arith.constant 0 : i32
    %c0_i32_0 = arith.constant 0 : i32
    %c0_i32_1 = arith.constant 0 : i32
    return %c0_i32, %c0_i32_0 : i32, i32
  }
  func.func @transform_8(%arg0: i32) -> (i32, i32) {
    %c0_i32 = arith.constant 0 : i32
    %c0_i32_0 = arith.constant 0 : i32
    return %arg0, %c0_i32 : i32, i32
  }
}

</mosaic_0001>

<bundles_post_ra>
// kernel: tpu_custom_call.1
= control target key start
LH: loop header
LB: loop body
LE: loop exit
PB: predicated region body
PF: predicated region fallthrough
CT: control target
= control target key end

     0   :  { %13 = vsyncpa [#allocation3], 0  ;;  %s2847_s0 = inlined_call_operand.hbm [shape: bf16[8,128], index: 0, kind: input, shape index: {}]   ;;  %s2848_s1 = inlined_call_operand.hbm [shape: f32[8,8], index: 1, kind: input, shape index: {}]   ;;  %s2849_s2 = inlined_call_operand.hbm [shape: f32[8,128], index: 2, kind: input, shape index: {}]   ;;  %s2850_s3 = inlined_call_operand.hbm [shape: bf16[128,128], index: 3, kind: input, shape index: {}]   ;;  %s2851_s4 = inlined_call_operand.hbm [shape: bf16[128,256], index: 4, kind: input, shape index: {}]   ;;  %s2852_s5 = inlined_call_operand.hbm [shape: bf16[256,512], index: 5, kind: input, shape index: {}]   ;;  %s2853_s6 = inlined_call_operand.hbm [shape: bf16[512,512], index: 6, kind: input, shape index: {}]   ;;  %s2854_s7 = inlined_call_operand.vmem [shape: f32[1,1280], index: 7, kind: input, shape index: {}]   ;;  %s2855_s8 = inlined_call_operand.hbm [shape: f32[8,512], index: 8, kind: output, shape index: {}]  }
   0x1   :  { %14 = vsyncpa [#allocation6], 0 }
   0x2   :  { %15 = vsyncpa [#allocation9], 0 }
   0x3   :  { %16 = vsyncpa [#allocation12], 0 }
   0x4   :  { %17 = vsyncpa [#allocation4], 0  ;;  %s2714_s27 = smov [#allocation5]   ;;  %s2715_s29 = smov [#allocation8]  }
   0x5   :  { %s34_s28 = sshll.u32 %s2714_s27, 4  ;;  %s53_s30 = sshll.u32 %s2715_s29, 4  ;;  %s35_s28 = int_to_ptr.vmem [resolvable:$true] %s34_s28  ;;  %s54_s30 = int_to_ptr.vmem [resolvable:$true] %s53_s30 }
   0x6   :  { %s2552_s9 = scalar_lea.vmem %s35_s28, 128  ;;  %p2557_p1 = scmp.lt.s32.totalorder %s35_s28, %s35_s28 }
   0x7   :  { %p2553_p0 = scmp.ne.s32.totalorder %s35_s28, %s2552_s9  ;;  %p2558_p2 = scmp.lt.s32.totalorder %s2552_s9, %s2552_s9 }
   0x9   :  { %p2559_p3 = por %p2558_p2, %p2557_p1 }
   0xb   :  { %p2560_p4 = pnand %p2559_p3, %p2553_p0 }
   0xd   :  { %2563 = shalt.err (!%p2560_p4)
}
   0xe   :  { %37 = dma.hbm_to_vmem [thread:$0]  %s2848_s1, 128, %s35_s28, [#allocation6]  }
   0xf   :  { %s2572_s12 = scalar_lea.vmem %s54_s30, 1024  ;;  %p2577_p6 = scmp.lt.s32.totalorder %s54_s30, %s54_s30 }
  0x10   :  { %p2573_p5 = scmp.ne.s32.totalorder %s54_s30, %s2572_s12  ;;  %p2578_p7 = scmp.lt.s32.totalorder %s2572_s12, %s2572_s12 }
  0x12   :  { %p2579_p8 = por %p2578_p7, %p2577_p6 }
  0x14   :  { %p2580_p9 = pnand %p2579_p8, %p2573_p5 }
  0x16   :  { %2583 = shalt.err (!%p2580_p9)
}
  0x17   :  { %s2716_s13 = smov 64   ;;  %s2717_s14 = smov 4  }
  0x18   :  { %59 = dma.hbm_to_vmem [thread:$0]  %s2850_s3, 1024, %s54_s30, [#allocation9], %s2716_s13, %s2716_s13, %s2717_s14  }
  0x19   :  { %s2718_s17 = smov [#allocation11]  }
  0x1a   :  { %s77_s18 = sshll.u32 %s2718_s17, 4  ;;  %s78_s18 = int_to_ptr.vmem [resolvable:$true] %s77_s18 }
  0x1b   :  { %s2592_s19 = scalar_lea.vmem %s78_s18, 8192  ;;  %p2597_p11 = scmp.lt.s32.totalorder %s78_s18, %s78_s18 }
  0x1c   :  { %p2593_p10 = scmp.ne.s32.totalorder %s78_s18, %s2592_s19  ;;  %p2598_p12 = scmp.lt.s32.totalorder %s2592_s19, %s2592_s19 }
  0x1e   :  { %p2599_p13 = por %p2598_p12, %p2597_p11 }
  0x20   :  { %p2600_p0 = pnand %p2599_p13, %p2593_p10 }
  0x22   :  { %2603 = shalt.err (!%p2600_p0)
}
  0x23   :  { %s2719_s1 = smov 256   ;;  %s2720_s20 = smov 16  }
  0x24   :  { %83 = dma.hbm_to_vmem [thread:$0]  %s2852_s5, 8192, %s78_s18, [#allocation12], %s2719_s1, %s2719_s1, %s2720_s20  }
  0x25   :  { %s2721_s3 = smov [#allocation2]   ;;  %s2722_s24 = smov [#allocation7]  }
  0x26   :  { %s24_s23 = sshll.u32 %s2721_s3, 4  ;;  %s44_s25 = sshll.u32 %s2722_s24, 4  ;;  %s25_s23 = int_to_ptr.vmem [resolvable:$true] %s24_s23  ;;  %s45_s25 = int_to_ptr.vmem [resolvable:$true] %s44_s25 }
  0x27   :  { %s2612_s26 = scalar_lea.vmem %s25_s23, 64  ;;  %p2617_p2 = scmp.lt.s32.totalorder %s25_s23, %s25_s23 }
  0x28   :  { %p2613_p1 = scmp.ne.s32.totalorder %s25_s23, %s2612_s26  ;;  %p2618_p3 = scmp.lt.s32.totalorder %s2612_s26, %s2612_s26 }
  0x2a   :  { %p2619_p4 = por %p2618_p3, %p2617_p2 }
  0x2c   :  { %p2620_p5 = pnand %p2619_p4, %p2613_p1 }
  0x2e   :  { %2623 = shalt.err (!%p2620_p5)
}
  0x2f   :  { %27 = dma.hbm_to_vmem [thread:$0]  %s2847_s0, 64, %s25_s23, [#allocation3]  }
  0x30   :  { %s2632_s29 = scalar_lea.vmem %s45_s25, 128  ;;  %p2637_p7 = scmp.lt.s32.totalorder %s45_s25, %s45_s25 }
  0x31   :  { %p2633_p6 = scmp.ne.s32.totalorder %s45_s25, %s2632_s29  ;;  %p2638_p8 = scmp.lt.s32.totalorder %s2632_s29, %s2632_s29 }
  0x33   :  { %p2639_p9 = por %p2638_p8, %p2637_p7 }
  0x35   :  { %p2640_p10 = pnand %p2639_p9, %p2633_p6 }
  0x37   :  { %2643 = shalt.err (!%p2640_p10)
}
  0x38   :  { %47 = dma.hbm_to_vmem [thread:$0]  %s2849_s2, 128, %s45_s25, [#allocation6]  }
  0x39   :  { %s2723_s9 = smov [#allocation10]  }
  0x3a   :  { %s65_s10 = sshll.u32 %s2723_s9, 4  ;;  %s66_s10 = int_to_ptr.vmem [resolvable:$true] %s65_s10 }
  0x3b   :  { %s2652_s11 = scalar_lea.vmem %s66_s10, 2048  ;;  %p2657_p12 = scmp.lt.s32.totalorder %s66_s10, %s66_s10 }
  0x3c   :  { %p2653_p11 = scmp.ne.s32.totalorder %s66_s10, %s2652_s11  ;;  %p2658_p13 = scmp.lt.s32.totalorder %s2652_s11, %s2652_s11 }
  0x3e   :  { %p2659_p0 = por %p2658_p13, %p2657_p12 }
  0x40   :  { %p2660_p1 = pnand %p2659_p0, %p2653_p11 }
  0x42   :  { %2663 = shalt.err (!%p2660_p1)
}
  0x43   :  { %s2724_s0 = smov 128   ;;  %s2725_s12 = smov 8  }
  0x44   :  { %71 = dma.hbm_to_vmem [thread:$0]  %s2851_s4, 2048, %s66_s10, [#allocation9], %s2724_s0, %s2724_s0, %s2725_s12  }
  0x45   :  { %s2726_s15 = smov [#allocation13]  }
  0x46   :  { %s89_s16 = sshll.u32 %s2726_s15, 4  ;;  %s90_s16 = int_to_ptr.vmem [resolvable:$true] %s89_s16 }
  0x47   :  { %s2672_s2 = scalar_lea.vmem %s90_s16, 16384  ;;  %p2677_p3 = scmp.lt.s32.totalorder %s90_s16, %s90_s16 }
  0x48   :  { %p2673_p2 = scmp.ne.s32.totalorder %s90_s16, %s2672_s2  ;;  %p2678_p4 = scmp.lt.s32.totalorder %s2672_s2, %s2672_s2 }
  0x4a   :  { %p2679_p5 = por %p2678_p4, %p2677_p3 }
  0x4c   :  { %p2680_p6 = pnand %p2679_p5, %p2673_p2 }
  0x4e   :  { %2683 = shalt.err (!%p2680_p6)
}
  0x4f   :  { %95 = dma.hbm_to_vmem [thread:$0]  %s2853_s6, 16384, %s90_s16, [#allocation12], %s2719_s1, %s2719_s1, %s2720_s20  }
  0x50   :  { %2704 = dma.done.wait [#allocation3], 64  }
  0x51   :  { %2705 = vsyncadd [#allocation3], 4294967232 }
  0x52   :  { %2706 = dma.done.wait [#allocation6], 256  }
  0x53   :  { %2707 = vsyncadd [#allocation6], 4294967040 }
  0x54   :  { %2708 = dma.done.wait [#allocation9], 3072  }
  0x55   :  { %2709 = vsyncadd [#allocation9], 4294964224 }
  0x56   :  { %2710 = dma.done.wait [#allocation12], 24576  }
  0x57   :  { %2711 = vsyncadd [#allocation12], 4294942720  ;;  %v2727_v0 = vmov 0.0   ;;  %vm2728_vm0 = vmmov 0   ;;  %v2216_v1 = vld [vmem:[#allocation8 + $0x38] sm:$0xff]   ;;  %v2217_v2 = vld [vmem:[#allocation8 + $0x30] sm:$0xff]  }
  0x58   :  { %2179 = vmatprep.subr.bf16.mxu1 %v2727_v0  ;;  %2174 = vmatprep.subr.mxu0 %v2727_v0  ;;  %v2218_v3 = vld [vmem:[#allocation8 + $0x28] sm:$0xff]   ;;  %vm139_vm1 = vcmask 64512   ;;  %v138_v4 = vld [vmem:[#allocation7] sm:$0xff]  ;;  %v2219_v5 = vld [vmem:[#allocation8 + $0x20] sm:$0xff]   ;;  %v2729_v28 = vmov 0  }
  0x59   :  { %2176 = vmatprep.mubr.msk.f32.mxu0 %vm2728_vm0, %v2727_v0  ;;  %2195 = vmatprep.mubr.msk.bf16.mxu1 %vm2728_vm0, %v2727_v0  ;;  %v137_v6 = vld [vmem:[#allocation5] sm:$0xff]  ;;  %v2229_v9 = vld [vmem:[#allocation10 + $0x64] ss:$8 sps:$4 sm:$0xff]   ;;  %v2220_v10 = vld [vmem:[#allocation8 + $0x18] sm:$0xff]  }
  0x5a   :  { %2180 = vmatpush3.bf16.msra.mxu1 %v2216_v1  ;;  %2175 = vmatpush3.msra.mxu0 %v138_v4  ;;  %v2224_v7 = vld [vmem:[#allocation10 + $0x70] ss:$8 sps:$4 sm:$0xff]   ;;  %v2226_v8 = vld [vmem:[#allocation10 + $0x74] ss:$8 sps:$4 sm:$0xff]   ;;  %v2227_v11 = vld [vmem:[#allocation10 + $0x60] ss:$8 sps:$4 sm:$0xff]  }
  0x5b   :  { %2181 = vmatprep.subr.bf16.mxu1 %v2727_v0  ;;  %2177 = vmatmul.mubr.msk.f32.vlgmr.msra.gmra.mxu0 %vm139_vm1, %v137_v6  ;;  %v2232_v12 = vld [vmem:[#allocation10 + $0x54] ss:$8 sps:$4 sm:$0xff]   ;;  %v2230_v14 = vld [vmem:[#allocation10 + $0x50] ss:$8 sps:$4 sm:$0xff]   ;;  %v2235_v15 = vld [vmem:[#allocation10 + $0x44] ss:$8 sps:$4 sm:$0xff]  }
  0x5c   :  { %413 = vmatprep.subr.bf16.mxu0 %v2226_v8  ;;  %v2221_v13 = vld [vmem:[#allocation8 + $0x10] sm:$0xff]   ;;  %v2233_v16 = vld [vmem:[#allocation10 + $0x40] ss:$8 sps:$4 sm:$0xff]   ;;  %v2241_v21 = vld [vmem:[#allocation10 + $0x24] ss:$8 sps:$4 sm:$0xff]   ;;  %445 = vmatprep.mubr.bf16.mxu0 %v2729_v28 }
  0x5d   :  { %414 = vmatpush1.bf16.msra.mxu0 %v2224_v7  ;;  %v2222_v17 = vld [vmem:[#allocation8 + $0x8] sm:$0xff]   ;;  %v2238_v18 = vld [vmem:[#allocation10 + $0x34] ss:$8 sps:$4 sm:$0xff]   ;;  %v2236_v19 = vld [vmem:[#allocation10 + $0x30] ss:$8 sps:$4 sm:$0xff]  }
  0x5e   :  { %2182 = vmatpush3.bf16.msra.mxu1 %v2217_v2  ;;  %415 = vmatprep.subr.bf16.mxu0 %v2229_v9  ;;  %v2223_v20 = vld [vmem:[#allocation8] sm:$0xff]   ;;  %v120_v23 = vld [vmem:[#allocation2] sm:$0xf]  ;;  %v2244_v24 = vld [vmem:[#allocation10 + $0x14] ss:$8 sps:$4 sm:$0xff]  }
  0x5f   :  { %2183 = vmatprep.subr.bf16.mxu1 %v2727_v0  ;;  %v2239_v22 = vld [vmem:[#allocation10 + $0x20] ss:$8 sps:$4 sm:$0xff]   ;;  %v2242_v25 = vld [vmem:[#allocation10 + $0x10] ss:$8 sps:$4 sm:$0xff]   ;;  %v2247_v26 = vld [vmem:[#allocation10 + $0x4] ss:$8 sps:$4 sm:$0xff]  }
  0x60   :  { %v2245_v27 = vld [vmem:[#allocation10] ss:$8 sps:$4 sm:$0xff]   ;;  %v2250_v30 = vld [vmem:[#allocation11 + $0xe4] ss:$16 sps:$4 sm:$0xff]   ;;  %v2253_v31 = vld [vmem:[#allocation11 + $0xec] ss:$16 sps:$4 sm:$0xff]  }
  0x61   :  { %416 = vmatpush1.bf16.msra.mxu0 %v2227_v11  ;;  %v2248_v29 = vld [vmem:[#allocation11 + $0xe0] ss:$16 sps:$4 sm:$0xff]   ;;  %v2256_v32 = vld [vmem:[#allocation11 + $0xc4] ss:$16 sps:$4 sm:$0xff]   ;;  %v2251_v2 = vld [vmem:[#allocation11 + $0xe8] ss:$16 sps:$4 sm:$0xff]  }
  0x62   :  { %2184 = vmatpush3.bf16.msra.mxu1 %v2218_v3  ;;  %417 = vmatprep.subr.bf16.mxu0 %v2232_v12  ;;  %v2254_v33 = vld [vmem:[#allocation11 + $0xc0] ss:$16 sps:$4 sm:$0xff]   ;;  %v2262_v34 = vld [vmem:[#allocation11 + $0xa4] ss:$16 sps:$4 sm:$0xff]   ;;  %v2257_v6 = vld [vmem:[#allocation11 + $0xc8] ss:$16 sps:$4 sm:$0xff]  }
  0x63   :  { %2185 = vmatprep.subr.bf16.mxu1 %v2727_v0  ;;  %v2260_v35 = vld [vmem:[#allocation11 + $0xa0] ss:$16 sps:$4 sm:$0xff]   ;;  %v2268_v36 = vld [vmem:[#allocation11 + $0x84] ss:$16 sps:$4 sm:$0xff]   ;;  %v2265_v7 = vld [vmem:[#allocation11 + $0xac] ss:$16 sps:$4 sm:$0xff]  }
  0x64   :  { %v2266_v37 = vld [vmem:[#allocation11 + $0x80] ss:$16 sps:$4 sm:$0xff]   ;;  %v2274_v38 = vld [vmem:[#allocation11 + $0x64] ss:$16 sps:$4 sm:$0xff]   ;;  %v2263_v8 = vld [vmem:[#allocation11 + $0xa8] ss:$16 sps:$4 sm:$0xff]  }
  0x65   :  { %418 = vmatpush1.bf16.msra.mxu0 %v2230_v14  ;;  %v2272_v39 = vld [vmem:[#allocation11 + $0x60] ss:$16 sps:$4 sm:$0xff]   ;;  %v2280_v40 = vld [vmem:[#allocation11 + $0x44] ss:$16 sps:$4 sm:$0xff]   ;;  %v2271_v9 = vld [vmem:[#allocation11 + $0x8c] ss:$16 sps:$4 sm:$0xff]  }
  0x66   :  { %2186 = vmatpush3.bf16.msra.mxu1 %v2219_v5  ;;  %419 = vmatprep.subr.bf16.mxu0 %v2235_v15  ;;  %v2278_v41 = vld [vmem:[#allocation11 + $0x40] ss:$16 sps:$4 sm:$0xff]   ;;  %v2286_v42 = vld [vmem:[#allocation11 + $0x24] ss:$16 sps:$4 sm:$0xff]   ;;  %v2259_v5 = vld [vmem:[#allocation11 + $0xcc] ss:$16 sps:$4 sm:$0xff]  }
  0x67   :  { %2187 = vmatprep.subr.bf16.mxu1 %v2727_v0  ;;  %v2284_v43 = vld [vmem:[#allocation11 + $0x20] ss:$16 sps:$4 sm:$0xff]   ;;  %v2292_v44 = vld [vmem:[#allocation11 + $0x4] ss:$16 sps:$4 sm:$0xff]   ;;  %v2277_v11 = vld [vmem:[#allocation11 + $0x6c] ss:$16 sps:$4 sm:$0xff]  }
  0x68   :  { %v2290_v45 = vld [vmem:[#allocation11] ss:$16 sps:$4 sm:$0xff]   ;;  %v2298_v46 = vld [vmem:[#allocation11 + $0x1e4] ss:$16 sps:$4 sm:$0xff]   ;;  %v2275_v12 = vld [vmem:[#allocation11 + $0x68] ss:$16 sps:$4 sm:$0xff]  }
  0x69   :  { %420 = vmatpush1.bf16.msra.mxu0 %v2233_v16  ;;  %v2296_v47 = vld [vmem:[#allocation11 + $0x1e0] ss:$16 sps:$4 sm:$0xff]   ;;  %v2304_v48 = vld [vmem:[#allocation11 + $0x1c4] ss:$16 sps:$4 sm:$0xff]   ;;  %v2281_v14 = vld [vmem:[#allocation11 + $0x48] ss:$16 sps:$4 sm:$0xff]  }
  0x6a   :  { %2188 = vmatpush3.bf16.msra.mxu1 %v2220_v10  ;;  %421 = vmatprep.subr.bf16.mxu0 %v2238_v18  ;;  %v2302_v49 = vld [vmem:[#allocation11 + $0x1c0] ss:$16 sps:$4 sm:$0xff]   ;;  %v2310_v50 = vld [vmem:[#allocation11 + $0x1a4] ss:$16 sps:$4 sm:$0xff]   ;;  %v2269_v10 = vld [vmem:[#allocation11 + $0x88] ss:$16 sps:$4 sm:$0xff]  }
  0x6b   :  { %2189 = vmatprep.subr.bf16.mxu1 %v2727_v0  ;;  %v2308_v51 = vld [vmem:[#allocation11 + $0x1a0] ss:$16 sps:$4 sm:$0xff]   ;;  %v2316_v52 = vld [vmem:[#allocation11 + $0x184] ss:$16 sps:$4 sm:$0xff]   ;;  %v2289_v15 = vld [vmem:[#allocation11 + $0x2c] ss:$16 sps:$4 sm:$0xff]  }
  0x6c   :  { %v2314_v53 = vld [vmem:[#allocation11 + $0x180] ss:$16 sps:$4 sm:$0xff]   ;;  %v2322_v54 = vld [vmem:[#allocation11 + $0x164] ss:$16 sps:$4 sm:$0xff]   ;;  %v2287_v16 = vld [vmem:[#allocation11 + $0x28] ss:$16 sps:$4 sm:$0xff]  }
  0x6d   :  { %422 = vmatpush1.bf16.msra.mxu0 %v2236_v19  ;;  %v2320_v55 = vld [vmem:[#allocation11 + $0x160] ss:$16 sps:$4 sm:$0xff]   ;;  %v2328_v56 = vld [vmem:[#allocation11 + $0x144] ss:$16 sps:$4 sm:$0xff]   ;;  %v2293_v18 = vld [vmem:[#allocation11 + $0x8] ss:$16 sps:$4 sm:$0xff]  }
  0x6e   :  { %2190 = vmatpush3.bf16.msra.mxu1 %v2221_v13  ;;  %423 = vmatprep.subr.bf16.mxu0 %v2241_v21  ;;  %v2326_v57 = vld [vmem:[#allocation11 + $0x140] ss:$16 sps:$4 sm:$0xff]   ;;  %v2283_v13 = vld [vmem:[#allocation11 + $0x4c] ss:$16 sps:$4 sm:$0xff]   ;;  %v2323_v28 = vld [vmem:[#allocation11 + $0x168] ss:$16 sps:$4 sm:$0xff]  }
  0x6f   :  { %2191 = vmatprep.subr.bf16.mxu1 %v2727_v0  ;;  %v2301_v19 = vld [vmem:[#allocation11 + $0x1ec] ss:$16 sps:$4 sm:$0xff]  }
  0x70   :  { %v2307_v21 = vld [vmem:[#allocation11 + $0x1cc] ss:$16 sps:$4 sm:$0xff]  }
  0x71   :  { %424 = vmatpush1.bf16.msra.mxu0 %v2239_v22  ;;  %v2305_v22 = vld [vmem:[#allocation11 + $0x1c8] ss:$16 sps:$4 sm:$0xff]  }
  0x72   :  { %2192 = vmatpush3.bf16.msra.mxu1 %v2222_v17  ;;  %425 = vmatprep.subr.bf16.mxu0 %v2244_v24  ;;  %v2295_v17 = vld [vmem:[#allocation11 + $0xc] ss:$16 sps:$4 sm:$0xff]   ;;  %v2311_v24 = vld [vmem:[#allocation11 + $0x1a8] ss:$16 sps:$4 sm:$0xff]  }
  0x73   :  { %2193 = vmatprep.subr.bf16.mxu1 %v2727_v0 }
  0x75   :  { %426 = vmatpush1.bf16.msra.mxu0 %v2242_v25  ;;  %v2319_v25 = vld [vmem:[#allocation11 + $0x18c] ss:$16 sps:$4 sm:$0xff]  }
  0x76   :  { %2194 = vmatpush3.bf16.msra.mxu1 %v2223_v20  ;;  %427 = vmatprep.subr.bf16.mxu0 %v2247_v26  ;;  %v2299_v20 = vld [vmem:[#allocation11 + $0x1e8] ss:$16 sps:$4 sm:$0xff]  }
  0x77   :  { %868 = vmatprep.subr.bf16.mxu1 %v2250_v30  ;;  %v2317_v26 = vld [vmem:[#allocation11 + $0x188] ss:$16 sps:$4 sm:$0xff]  }
  0x78   :  { %v2329_v30 = vld [vmem:[#allocation11 + $0x148] ss:$16 sps:$4 sm:$0xff]  }
  0x79   :  { %2196 = vmatmul.mubr.bf16.vlgmr.msra.gmra.mxu1 %v120_v23  ;;  %428 = vmatpush1.bf16.msra.mxu0 %v2245_v27  ;;  %v2313_v23 = vld [vmem:[#allocation11 + $0x1ac] ss:$16 sps:$4 sm:$0xff]  }
  0x7a   :  { %909 = vmatprep.subr.bf16.mxu0 %v2253_v31  ;;  %869 = vmatpush1.bf16.msra.mxu1 %v2248_v29  ;;  %v2325_v27 = vld [vmem:[#allocation11 + $0x16c] ss:$16 sps:$4 sm:$0xff]   ;;  %v2334_v31 = vld [vmem:[#allocation11 + $0x124] ss:$16 sps:$4 sm:$0xff]  }
  0x7b   :  { %870 = vmatprep.subr.bf16.mxu1 %v2256_v32  ;;  %v2331_v29 = vld [vmem:[#allocation11 + $0x14c] ss:$16 sps:$4 sm:$0xff]  }
  0x7c   :  { %v2337_v32 = vld [vmem:[#allocation11 + $0x12c] ss:$16 sps:$4 sm:$0xff]  }
  0x7e   :  { %871 = vmatpush1.bf16.msra.mxu1 %v2254_v33  ;;  %v2332_v33 = vld [vmem:[#allocation11 + $0x120] ss:$16 sps:$4 sm:$0xff]  }
  0x7f   :  { %872 = vmatprep.subr.bf16.mxu1 %v2262_v34  ;;  %v2335_v34 = vld [vmem:[#allocation11 + $0x128] ss:$16 sps:$4 sm:$0xff]  }
  0x82   :  { %873 = vmatpush1.bf16.msra.mxu1 %v2260_v35  ;;  %v2340_v35 = vld [vmem:[#allocation11 + $0x104] ss:$16 sps:$4 sm:$0xff]  }
  0x83   :  { %874 = vmatprep.subr.bf16.mxu1 %v2268_v36  ;;  %v2343_v36 = vld [vmem:[#allocation11 + $0x10c] ss:$16 sps:$4 sm:$0xff]  }
  0x86   :  { %875 = vmatpush1.bf16.msra.mxu1 %v2266_v37  ;;  %v2338_v37 = vld [vmem:[#allocation11 + $0x100] ss:$16 sps:$4 sm:$0xff]  }
  0x87   :  { %876 = vmatprep.subr.bf16.mxu1 %v2274_v38  ;;  %v2341_v38 = vld [vmem:[#allocation11 + $0x108] ss:$16 sps:$4 sm:$0xff]  }
  0x8a   :  { %877 = vmatpush1.bf16.msra.mxu1 %v2272_v39  ;;  %v2346_v39 = vld [vmem:[#allocation13 + $0xe4] ss:$16 sps:$4 sm:$0xff]  }
  0x8b   :  { %878 = vmatprep.subr.bf16.mxu1 %v2280_v40  ;;  %v2349_v40 = vld [vmem:[#allocation13 + $0x2e4] ss:$16 sps:$4 sm:$0xff]  }
  0x8e   :  { %879 = vmatpush1.bf16.msra.mxu1 %v2278_v41  ;;  %v323_v41 = vlaneseq }
  0x8f   :  { %880 = vmatprep.subr.bf16.mxu1 %v2286_v42 }
  0x90   :  { %v2803_v42 = vshrl.u32 %v323_v41, 7  ;;  %v2413_v41 = vld [vmem:[#allocation13 + $0x380] ss:$16 sps:$4 sm:$0xff]  }
  0x92   :  { %881 = vmatpush1.bf16.msra.mxu1 %v2284_v43  ;;  %v2806_v43 = vsub.s32 0, %v2803_v42 }
  0x93   :  { %882 = vmatprep.subr.bf16.mxu1 %v2292_v44  ;;  %v321_v44 = vld [vmem:[%s2854_s7] sm:$0x3] }
  0x96   :  { %883 = vmatpush1.bf16.msra.mxu1 %v2290_v45  ;;  %v2812_v45 = vsub.s32 1, %v2803_v42 }
  0x97   :  { %884 = vmatprep.subr.bf16.mxu1 %v2298_v46  ;;  %v326_v46 = vrot.slane %v321_v44, %v2806_v43 }
  0x9a   :  { %885 = vmatpush2.bf16.msra.mxu1 %v2296_v47  ;;  %v330_v47 = vrot.slane %v321_v44, %v2812_v45  ;;  %v2418_v44 = vld [vmem:[#allocation13 + $0x164] ss:$16 sps:$4 sm:$0xff]  }
  0x9b   :  { %886 = vmatprep.subr.bf16.mxu1 %v2304_v48 }
  0x9e   :  { %887 = vmatpush2.bf16.msra.mxu1 %v2302_v49 }
  0x9f   :  { %888 = vmatprep.subr.bf16.mxu1 %v2310_v50 }
  0xa2   :  { %889 = vmatpush2.bf16.msra.mxu1 %v2308_v51 }
  0xa3   :  { %890 = vmatprep.subr.bf16.mxu1 %v2316_v52 }
  0xa6   :  { %891 = vmatpush2.bf16.msra.mxu1 %v2314_v53 }
  0xa7   :  { %892 = vmatprep.subr.bf16.mxu1 %v2322_v54 }
  0xaa   :  { %893 = vmatpush2.bf16.msra.mxu1 %v2320_v55 }
  0xab   :  { %894 = vmatprep.subr.bf16.mxu1 %v2328_v56 }
  0xae   :  { %895 = vmatpush2.bf16.msra.mxu1 %v2326_v57 }
  0xaf   :  { %896 = vmatprep.subr.bf16.mxu1 %v2334_v31  ;;  %v2403_v31 = vld [vmem:[#allocation13 + $0x3c4] ss:$16 sps:$4 sm:$0xff]  }
  0xb2   :  { %897 = vmatpush2.bf16.msra.mxu1 %v2332_v33  ;;  %v2401_v33 = vld [vmem:[#allocation13 + $0x3c0] ss:$16 sps:$4 sm:$0xff]  }
  0xb3   :  { %898 = vmatprep.subr.bf16.mxu1 %v2340_v35  ;;  %v2409_v35 = vld [vmem:[#allocation13 + $0x3a4] ss:$16 sps:$4 sm:$0xff]  }
  0xb6   :  { %899 = vmatpush2.bf16.msra.mxu1 %v2338_v37  ;;  %v2407_v37 = vld [vmem:[#allocation13 + $0x3a0] ss:$16 sps:$4 sm:$0xff]  }
  0xb7   :  { %1756 = vmatprep.subr.bf16.mxu1 %v2346_v39  ;;  %v2415_v39 = vld [vmem:[#allocation13 + $0x384] ss:$16 sps:$4 sm:$0xff]  }
 0x11b   :  { %v209_v58 = vpop.f32.mrf.mxu0 }
 0x11d   :  { %v2178_v59 = vpop.f32.mrf.mxu0 }
 0x11e   :  { %v2344_v59 = vld [vmem:[#allocation13 + $0xe0] ss:$16 sps:$4 sm:$0xff]  }
 0x139   :  { %v295_v60 = vpop.f32.mrf.mxu1 }
 0x13a   :  { %v296_v61 = vadd.f32 %v295_v60, %v209_v58  ;;  %v2347_v60 = vld [vmem:[#allocation13 + $0x2e0] ss:$16 sps:$4 sm:$0xff]  }
 0x13b   :  { %v2197_v62 = vpop.f32.mrf.mxu1 }
 0x13c   :  { %vm301_vm2 = vcmp.gt.f32.partialorder %v296_v61, 0.0  ;;  %v302_v63 = vmul.f32 0.2, %v296_v61  ;;  %v2352_v62 = vld [vmem:[#allocation13 + $0xc4] ss:$16 sps:$4 sm:$0xff]  }
 0x13d   :  { %v298_v0 = vpop.f32.mrf.mxu1 }
 0x13e   :  { %v303_v1 = vsel %vm301_vm2, %v296_v61, %v302_v63  ;;  %v2355_v63 = vld [vmem:[#allocation13 + $0x2c4] ss:$16 sps:$4 sm:$0xff]   ;;  %v2350_v0 = vld [vmem:[#allocation13 + $0xc0] ss:$16 sps:$4 sm:$0xff]  }
 0x13f   :  { %v304_v3 = vpack.c.bf16 %v303_v1, %v303_v1  ;;  %v2198_v4 = vpop.f32.mrf.mxu1  ;;  %v2353_v1 = vld [vmem:[#allocation13 + $0x2c0] ss:$16 sps:$4 sm:$0xff]  }
 0x140   :  { %v2356_v4 = vld [vmem:[#allocation13 + $0xa0] ss:$16 sps:$4 sm:$0xff]  }
 0x141   :  { %446 = vmatmul.mubr.bf16.vlgmr.msra.gmra.mxu0 %v304_v3  ;;  %v2361_v3 = vld [vmem:[#allocation13 + $0x2a4] ss:$16 sps:$4 sm:$0xff]  }
 0x142   :  { %910 = vmatpush1.bf16.msra.mxu0 %v2251_v2  ;;  %v2358_v2 = vld [vmem:[#allocation13 + $0xa4] ss:$16 sps:$4 sm:$0xff]  }
 0x143   :  { %911 = vmatprep.subr.bf16.mxu0 %v2259_v5  ;;  %v2359_v5 = vld [vmem:[#allocation13 + $0x2a0] ss:$16 sps:$4 sm:$0xff]  }
 0x146   :  { %912 = vmatpush1.bf16.msra.mxu0 %v2257_v6  ;;  %v2364_v6 = vld [vmem:[#allocation13 + $0x84] ss:$16 sps:$4 sm:$0xff]  }
 0x147   :  { %913 = vmatprep.subr.bf16.mxu0 %v2265_v7  ;;  %v2367_v7 = vld [vmem:[#allocation13 + $0x284] ss:$16 sps:$4 sm:$0xff]  }
 0x14a   :  { %914 = vmatpush1.bf16.msra.mxu0 %v2263_v8  ;;  %v2362_v8 = vld [vmem:[#allocation13 + $0x80] ss:$16 sps:$4 sm:$0xff]  }
 0x14b   :  { %915 = vmatprep.subr.bf16.mxu0 %v2271_v9  ;;  %v2365_v9 = vld [vmem:[#allocation13 + $0x280] ss:$16 sps:$4 sm:$0xff]  }
 0x14e   :  { %916 = vmatpush1.bf16.msra.mxu0 %v2269_v10  ;;  %v2370_v10 = vld [vmem:[#allocation13 + $0x64] ss:$16 sps:$4 sm:$0xff]  }
 0x14f   :  { %917 = vmatprep.subr.bf16.mxu0 %v2277_v11  ;;  %v2373_v11 = vld [vmem:[#allocation13 + $0x264] ss:$16 sps:$4 sm:$0xff]  }
 0x152   :  { %918 = vmatpush1.bf16.msra.mxu0 %v2275_v12  ;;  %v2368_v12 = vld [vmem:[#allocation13 + $0x60] ss:$16 sps:$4 sm:$0xff]  }
 0x153   :  { %919 = vmatprep.subr.bf16.mxu0 %v2283_v13  ;;  %v2371_v13 = vld [vmem:[#allocation13 + $0x260] ss:$16 sps:$4 sm:$0xff]  }
 0x156   :  { %920 = vmatpush1.bf16.msra.mxu0 %v2281_v14  ;;  %v2376_v14 = vld [vmem:[#allocation13 + $0x44] ss:$16 sps:$4 sm:$0xff]  }
 0x157   :  { %921 = vmatprep.subr.bf16.mxu0 %v2289_v15  ;;  %v2379_v15 = vld [vmem:[#allocation13 + $0x244] ss:$16 sps:$4 sm:$0xff]  }
 0x15a   :  { %922 = vmatpush1.bf16.msra.mxu0 %v2287_v16  ;;  %v2374_v16 = vld [vmem:[#allocation13 + $0x40] ss:$16 sps:$4 sm:$0xff]  }
 0x15b   :  { %923 = vmatprep.subr.bf16.mxu0 %v2295_v17  ;;  %v2377_v17 = vld [vmem:[#allocation13 + $0x240] ss:$16 sps:$4 sm:$0xff]  }
 0x15e   :  { %924 = vmatpush1.bf16.msra.mxu0 %v2293_v18  ;;  %v2382_v18 = vld [vmem:[#allocation13 + $0x24] ss:$16 sps:$4 sm:$0xff]  }
 0x15f   :  { %925 = vmatprep.subr.bf16.mxu0 %v2301_v19  ;;  %v2385_v19 = vld [vmem:[#allocation13 + $0x224] ss:$16 sps:$4 sm:$0xff]  }
 0x162   :  { %926 = vmatpush2.bf16.msra.mxu0 %v2299_v20  ;;  %v2380_v20 = vld [vmem:[#allocation13 + $0x20] ss:$16 sps:$4 sm:$0xff]  }
 0x163   :  { %927 = vmatprep.subr.bf16.mxu0 %v2307_v21  ;;  %v2383_v21 = vld [vmem:[#allocation13 + $0x220] ss:$16 sps:$4 sm:$0xff]  }
 0x166   :  { %928 = vmatpush2.bf16.msra.mxu0 %v2305_v22  ;;  %v2388_v22 = vld [vmem:[#allocation13 + $0x4] ss:$16 sps:$4 sm:$0xff]  }
 0x167   :  { %929 = vmatprep.subr.bf16.mxu0 %v2313_v23  ;;  %v2391_v23 = vld [vmem:[#allocation13 + $0x204] ss:$16 sps:$4 sm:$0xff]  }
 0x16a   :  { %930 = vmatpush2.bf16.msra.mxu0 %v2311_v24  ;;  %v2386_v24 = vld [vmem:[#allocation13] ss:$16 sps:$4 sm:$0xff]  }
 0x16b   :  { %931 = vmatprep.subr.bf16.mxu0 %v2319_v25  ;;  %v2389_v25 = vld [vmem:[#allocation13 + $0x200] ss:$16 sps:$4 sm:$0xff]  }
 0x16e   :  { %932 = vmatpush2.bf16.msra.mxu0 %v2317_v26  ;;  %v2394_v26 = vld [vmem:[#allocation13 + $0x1e4] ss:$16 sps:$4 sm:$0xff]  }
 0x16f   :  { %933 = vmatprep.subr.bf16.mxu0 %v2325_v27  ;;  %v2397_v27 = vld [vmem:[#allocation13 + $0x3e4] ss:$16 sps:$4 sm:$0xff]  }
 0x172   :  { %934 = vmatpush2.bf16.msra.mxu0 %v2323_v28  ;;  %v2392_v28 = vld [vmem:[#allocation13 + $0x1e0] ss:$16 sps:$4 sm:$0xff]  }
 0x173   :  { %935 = vmatprep.subr.bf16.mxu0 %v2331_v29  ;;  %v2395_v29 = vld [vmem:[#allocation13 + $0x3e0] ss:$16 sps:$4 sm:$0xff]  }
 0x176   :  { %936 = vmatpush2.bf16.msra.mxu0 %v2329_v30  ;;  %v2400_v30 = vld [vmem:[#allocation13 + $0x1c4] ss:$16 sps:$4 sm:$0xff]  }
 0x177   :  { %937 = vmatprep.subr.bf16.mxu0 %v2337_v32  ;;  %v2398_v32 = vld [vmem:[#allocation13 + $0x1c0] ss:$16 sps:$4 sm:$0xff]  }
 0x17a   :  { %938 = vmatpush2.bf16.msra.mxu0 %v2335_v34  ;;  %v2406_v34 = vld [vmem:[#allocation13 + $0x1a4] ss:$16 sps:$4 sm:$0xff]  }
 0x17b   :  { %939 = vmatprep.subr.bf16.mxu0 %v2343_v36  ;;  %v2404_v36 = vld [vmem:[#allocation13 + $0x1a0] ss:$16 sps:$4 sm:$0xff]  }
 0x17e   :  { %940 = vmatpush2.bf16.msra.mxu0 %v2341_v38  ;;  %v2412_v38 = vld [vmem:[#allocation13 + $0x184] ss:$16 sps:$4 sm:$0xff]  }
 0x17f   :  { %1797 = vmatprep.subr.bf16.mxu0 %v2349_v40  ;;  %v2410_v40 = vld [vmem:[#allocation13 + $0x180] ss:$16 sps:$4 sm:$0xff]  }
 0x201   :  { %v447_v48 = vpop.f32.mrf.mxu0 }
 0x202   :  { %v448_v49 = vadd.f32 %v447_v48, %v326_v46  ;;  %v2421_v46 = vld [vmem:[#allocation13 + $0x364] ss:$16 sps:$4 sm:$0xff]   ;;  %v2419_v48 = vld [vmem:[#allocation13 + $0x360] ss:$16 sps:$4 sm:$0xff]  }
 0x203   :  { %v449_v50 = vpop.f32.mrf.mxu0 }
 0x204   :  { %vm454_vm3 = vcmp.gt.f32.partialorder %v448_v49, 0.0  ;;  %v456_v51 = vmul.f32 0.2, %v448_v49  ;;  %v450_v52 = vadd.f32 %v449_v50, %v330_v47  ;;  %v2416_v47 = vld [vmem:[#allocation13 + $0x160] ss:$16 sps:$4 sm:$0xff]  }
 0x205   :  { %v451_v53 = vpop.f32.mrf.mxu0  ;;  %v2427_v50 = vld [vmem:[#allocation13 + $0x344] ss:$16 sps:$4 sm:$0xff]  }
 0x206   :  { %vm455_vm4 = vcmp.gt.f32.partialorder %v450_v52, 0.0  ;;  %v457_v54 = vmul.f32 0.2, %v450_v52  ;;  %v458_v55 = vsel %vm454_vm3, %v448_v49, %v456_v51  ;;  %v2424_v49 = vld [vmem:[#allocation13 + $0x144] ss:$16 sps:$4 sm:$0xff]  }
 0x207   :  { %v452_v56 = vpop.f32.mrf.mxu0  ;;  %v460_v61 = vpack.c.bf16 %v458_v55, %v458_v55  ;;  %v2422_v51 = vld [vmem:[#allocation13 + $0x140] ss:$16 sps:$4 sm:$0xff]   ;;  %v2430_v53 = vld [vmem:[#allocation13 + $0x124] ss:$16 sps:$4 sm:$0xff]  }
 0x208   :  { %v459_v57 = vsel %vm455_vm4, %v450_v52, %v457_v54  ;;  %v2425_v52 = vld [vmem:[#allocation13 + $0x340] ss:$16 sps:$4 sm:$0xff]   ;;  %v2433_v54 = vld [vmem:[#allocation13 + $0x324] ss:$16 sps:$4 sm:$0xff]  }
 0x209   :  { %v461_v58 = vpack.c.bf16 %v459_v57, %v459_v57  ;;  %v2428_v55 = vld [vmem:[#allocation13 + $0x120] ss:$16 sps:$4 sm:$0xff]   ;;  %v2436_v57 = vld [vmem:[#allocation13 + $0x104] ss:$16 sps:$4 sm:$0xff]  }
 0x20a   :  { %v2431_v56 = vld [vmem:[#allocation13 + $0x320] ss:$16 sps:$4 sm:$0xff]  }
 0x20b   :  { %900 = vmatprep.mubr.bf16.mxu1 %v461_v58  ;;  %941 = vmatprep.mubr.bf16.mxu0 %v461_v58  ;;  %v2439_v58 = vld [vmem:[#allocation13 + $0x304] ss:$16 sps:$4 sm:$0xff]  }
 0x20c   :  { %901 = vmatmul.mubr.bf16.vlgmr.msra.gmra.mxu1 %v460_v61  ;;  %942 = vmatmul.mubr.bf16.vlgmr.msra.gmra.mxu0 %v460_v61  ;;  %v2442_v61 = vld [vmem:[#allocation13 + $0xec] ss:$16 sps:$4 sm:$0xff]  }
 0x20d   :  { %1757 = vmatpush1.bf16.msra.mxu1 %v2344_v59  ;;  %1798 = vmatpush1.bf16.msra.mxu0 %v2347_v60  ;;  %v2434_v59 = vld [vmem:[#allocation13 + $0x100] ss:$16 sps:$4 sm:$0xff]  }
 0x20e   :  { %1758 = vmatprep.subr.bf16.mxu1 %v2352_v62  ;;  %1799 = vmatprep.subr.bf16.mxu0 %v2355_v63  ;;  %v2437_v60 = vld [vmem:[#allocation13 + $0x300] ss:$16 sps:$4 sm:$0xff]   ;;  %v2445_v62 = vld [vmem:[#allocation13 + $0x2ec] ss:$16 sps:$4 sm:$0xff]   ;;  %v538_v63 = vsub.s32 2, %v2803_v42 }
 0x211   :  { %1759 = vmatpush1.bf16.msra.mxu1 %v2350_v0  ;;  %1800 = vmatpush1.bf16.msra.mxu0 %v2353_v1  ;;  %v526_v0 = vld [vmem:[%s2854_s7 + $0x2] sm:$0xf]  ;;  %v542_v1 = vsub.s32 3, %v2803_v42 }
 0x212   :  { %1760 = vmatprep.subr.bf16.mxu1 %v2358_v2  ;;  %1801 = vmatprep.subr.bf16.mxu0 %v2361_v3  ;;  %v531_v2 = vrot.slane %v526_v0, %v2806_v43  ;;  %v539_v3 = vrot.slane %v526_v0, %v538_v63 }
 0x215   :  { %1761 = vmatpush1.bf16.msra.mxu1 %v2356_v4  ;;  %1802 = vmatpush1.bf16.msra.mxu0 %v2359_v5 }
 0x216   :  { %1762 = vmatprep.subr.bf16.mxu1 %v2364_v6  ;;  %1803 = vmatprep.subr.bf16.mxu0 %v2367_v7  ;;  %v535_v6 = vrot.slane %v526_v0, %v2812_v45  ;;  %v543_v7 = vrot.slane %v526_v0, %v542_v1  ;;  %v2490_v0 = vld [vmem:[#allocation13 + $0x1ec] ss:$16 sps:$4 sm:$0xff]  }
 0x219   :  { %1763 = vmatpush1.bf16.msra.mxu1 %v2362_v8  ;;  %1804 = vmatpush1.bf16.msra.mxu0 %v2365_v9 }
 0x21a   :  { %1764 = vmatprep.subr.bf16.mxu1 %v2370_v10  ;;  %1805 = vmatprep.subr.bf16.mxu0 %v2373_v11 }
 0x21d   :  { %1765 = vmatpush1.bf16.msra.mxu1 %v2368_v12  ;;  %1806 = vmatpush1.bf16.msra.mxu0 %v2371_v13 }
 0x21e   :  { %1766 = vmatprep.subr.bf16.mxu1 %v2376_v14  ;;  %1807 = vmatprep.subr.bf16.mxu0 %v2379_v15 }
 0x221   :  { %1767 = vmatpush1.bf16.msra.mxu1 %v2374_v16  ;;  %1808 = vmatpush1.bf16.msra.mxu0 %v2377_v17 }
 0x222   :  { %1768 = vmatprep.subr.bf16.mxu1 %v2382_v18  ;;  %1809 = vmatprep.subr.bf16.mxu0 %v2385_v19 }
 0x225   :  { %1769 = vmatpush1.bf16.msra.mxu1 %v2380_v20  ;;  %1810 = vmatpush1.bf16.msra.mxu0 %v2383_v21 }
 0x226   :  { %1770 = vmatprep.subr.bf16.mxu1 %v2388_v22  ;;  %1811 = vmatprep.subr.bf16.mxu0 %v2391_v23 }
 0x229   :  { %1771 = vmatpush1.bf16.msra.mxu1 %v2386_v24  ;;  %1812 = vmatpush1.bf16.msra.mxu0 %v2389_v25 }
 0x22a   :  { %1772 = vmatprep.subr.bf16.mxu1 %v2394_v26  ;;  %1813 = vmatprep.subr.bf16.mxu0 %v2397_v27  ;;  %v2440_v27 = vld [vmem:[#allocation13 + $0xe8] ss:$16 sps:$4 sm:$0xff]  }
 0x22d   :  { %1773 = vmatpush2.bf16.msra.mxu1 %v2392_v28  ;;  %1814 = vmatpush2.bf16.msra.mxu0 %v2395_v29 }
 0x22e   :  { %1774 = vmatprep.subr.bf16.mxu1 %v2400_v30  ;;  %1815 = vmatprep.subr.bf16.mxu0 %v2403_v31  ;;  %v2443_v30 = vld [vmem:[#allocation13 + $0x2e8] ss:$16 sps:$4 sm:$0xff]  }
 0x231   :  { %1775 = vmatpush2.bf16.msra.mxu1 %v2398_v32  ;;  %1816 = vmatpush2.bf16.msra.mxu0 %v2401_v33  ;;  %v2448_v32 = vld [vmem:[#allocation13 + $0xcc] ss:$16 sps:$4 sm:$0xff]  }
 0x232   :  { %1776 = vmatprep.subr.bf16.mxu1 %v2406_v34  ;;  %1817 = vmatprep.subr.bf16.mxu0 %v2409_v35  ;;  %v2451_v33 = vld [vmem:[#allocation13 + $0x2cc] ss:$16 sps:$4 sm:$0xff]   ;;  %v2446_v34 = vld [vmem:[#allocation13 + $0xc8] ss:$16 sps:$4 sm:$0xff]  }
 0x233   :  { %v2449_v35 = vld [vmem:[#allocation13 + $0x2c8] ss:$16 sps:$4 sm:$0xff]  }
 0x235   :  { %1777 = vmatpush2.bf16.msra.mxu1 %v2404_v36  ;;  %1818 = vmatpush2.bf16.msra.mxu0 %v2407_v37  ;;  %v2454_v36 = vld [vmem:[#allocation13 + $0xac] ss:$16 sps:$4 sm:$0xff]  }
 0x236   :  { %1778 = vmatprep.subr.bf16.mxu1 %v2412_v38  ;;  %1819 = vmatprep.subr.bf16.mxu0 %v2415_v39  ;;  %v2457_v37 = vld [vmem:[#allocation13 + $0x2ac] ss:$16 sps:$4 sm:$0xff]   ;;  %v2452_v38 = vld [vmem:[#allocation13 + $0xa8] ss:$16 sps:$4 sm:$0xff]  }
 0x237   :  { %v2455_v39 = vld [vmem:[#allocation13 + $0x2a8] ss:$16 sps:$4 sm:$0xff]  }
 0x239   :  { %1779 = vmatpush2.bf16.msra.mxu1 %v2410_v40  ;;  %1820 = vmatpush2.bf16.msra.mxu0 %v2413_v41  ;;  %v2460_v40 = vld [vmem:[#allocation13 + $0x8c] ss:$16 sps:$4 sm:$0xff]  }
 0x23a   :  { %1780 = vmatprep.subr.bf16.mxu1 %v2418_v44  ;;  %1821 = vmatprep.subr.bf16.mxu0 %v2421_v46  ;;  %v2463_v41 = vld [vmem:[#allocation13 + $0x28c] ss:$16 sps:$4 sm:$0xff]   ;;  %v2458_v44 = vld [vmem:[#allocation13 + $0x88] ss:$16 sps:$4 sm:$0xff]  }
 0x23b   :  { %v2461_v46 = vld [vmem:[#allocation13 + $0x288] ss:$16 sps:$4 sm:$0xff]  }
 0x23d   :  { %1781 = vmatpush2.bf16.msra.mxu1 %v2416_v47  ;;  %1822 = vmatpush2.bf16.msra.mxu0 %v2419_v48  ;;  %v2466_v47 = vld [vmem:[#allocation13 + $0x6c] ss:$16 sps:$4 sm:$0xff]  }
 0x23e   :  { %1782 = vmatprep.subr.bf16.mxu1 %v2424_v49  ;;  %1823 = vmatprep.subr.bf16.mxu0 %v2427_v50  ;;  %v2469_v48 = vld [vmem:[#allocation13 + $0x26c] ss:$16 sps:$4 sm:$0xff]   ;;  %v2464_v49 = vld [vmem:[#allocation13 + $0x68] ss:$16 sps:$4 sm:$0xff]  }
 0x23f   :  { %v2467_v50 = vld [vmem:[#allocation13 + $0x268] ss:$16 sps:$4 sm:$0xff]  }
 0x241   :  { %1783 = vmatpush2.bf16.msra.mxu1 %v2422_v51  ;;  %1824 = vmatpush2.bf16.msra.mxu0 %v2425_v52  ;;  %v2472_v51 = vld [vmem:[#allocation13 + $0x4c] ss:$16 sps:$4 sm:$0xff]  }
 0x242   :  { %1784 = vmatprep.subr.bf16.mxu1 %v2430_v53  ;;  %1825 = vmatprep.subr.bf16.mxu0 %v2433_v54  ;;  %v2475_v52 = vld [vmem:[#allocation13 + $0x24c] ss:$16 sps:$4 sm:$0xff]   ;;  %v2470_v53 = vld [vmem:[#allocation13 + $0x48] ss:$16 sps:$4 sm:$0xff]  }
 0x243   :  { %v2473_v54 = vld [vmem:[#allocation13 + $0x248] ss:$16 sps:$4 sm:$0xff]  }
 0x245   :  { %1785 = vmatpush2.bf16.msra.mxu1 %v2428_v55  ;;  %1826 = vmatpush2.bf16.msra.mxu0 %v2431_v56  ;;  %v2478_v55 = vld [vmem:[#allocation13 + $0x2c] ss:$16 sps:$4 sm:$0xff]  }
 0x246   :  { %1786 = vmatprep.subr.bf16.mxu1 %v2436_v57  ;;  %1827 = vmatprep.subr.bf16.mxu0 %v2439_v58  ;;  %v2481_v56 = vld [vmem:[#allocation13 + $0x22c] ss:$16 sps:$4 sm:$0xff]   ;;  %v2476_v57 = vld [vmem:[#allocation13 + $0x28] ss:$16 sps:$4 sm:$0xff]  }
 0x247   :  { %v2479_v58 = vld [vmem:[#allocation13 + $0x228] ss:$16 sps:$4 sm:$0xff]  }
 0x249   :  { %1787 = vmatpush2.bf16.msra.mxu1 %v2434_v59  ;;  %1828 = vmatpush2.bf16.msra.mxu0 %v2437_v60  ;;  %v2484_v59 = vld [vmem:[#allocation13 + $0xc] ss:$16 sps:$4 sm:$0xff]  }
 0x24a   :  { %1838 = vmatprep.subr.bf16.mxu1 %v2442_v61  ;;  %1879 = vmatprep.subr.bf16.mxu0 %v2445_v62  ;;  %v2487_v60 = vld [vmem:[#allocation13 + $0x20c] ss:$16 sps:$4 sm:$0xff]   ;;  %v2482_v61 = vld [vmem:[#allocation13 + $0x8] ss:$16 sps:$4 sm:$0xff]  }
 0x24b   :  { %v2485_v62 = vld [vmem:[#allocation13 + $0x208] ss:$16 sps:$4 sm:$0xff]  }
 0x2cc   :  { %v902_v4 = vpop.f32.mrf.mxu1  ;;  %v943_v5 = vpop.f32.mrf.mxu0 }
 0x2cd   :  { %v903_v8 = vadd.f32 %v902_v4, %v531_v2  ;;  %v944_v9 = vadd.f32 %v943_v5, %v539_v3  ;;  %v2493_v2 = vld [vmem:[#allocation13 + $0x3ec] ss:$16 sps:$4 sm:$0xff]   ;;  %v2488_v3 = vld [vmem:[#allocation13 + $0x1e8] ss:$16 sps:$4 sm:$0xff]  }
 0x2ce   :  { %v904_v10 = vpop.f32.mrf.mxu1  ;;  %v945_v11 = vpop.f32.mrf.mxu0  ;;  %v2491_v4 = vld [vmem:[#allocation13 + $0x3e8] ss:$16 sps:$4 sm:$0xff]   ;;  %v2496_v5 = vld [vmem:[#allocation13 + $0x1cc] ss:$16 sps:$4 sm:$0xff]  }
 0x2cf   :  { %v954_v12 = vmul.f32 0.2, %v903_v8  ;;  %vm950_vm5 = vcmp.gt.f32.partialorder %v903_v8, 0.0  ;;  %v956_v13 = vmul.f32 0.2, %v944_v9  ;;  %v905_v14 = vadd.f32 %v904_v10, %v535_v6 }
 0x2d0   :  { %v946_v15 = vadd.f32 %v945_v11, %v543_v7  ;;  %v906_v16 = vpop.f32.mrf.mxu1  ;;  %v947_v17 = vpop.f32.mrf.mxu0  ;;  %vm952_vm6 = vcmp.gt.f32.partialorder %v944_v9, 0.0  ;;  %v2499_v6 = vld [vmem:[#allocation13 + $0x3cc] ss:$16 sps:$4 sm:$0xff]   ;;  %v2494_v7 = vld [vmem:[#allocation13 + $0x1c8] ss:$16 sps:$4 sm:$0xff]  }
 0x2d1   :  { %vm951_vm7 = vcmp.gt.f32.partialorder %v905_v14, 0.0  ;;  %v955_v18 = vmul.f32 0.2, %v905_v14  ;;  %v958_v21 = vsel %vm950_vm5, %v903_v8, %v954_v12  ;;  %v960_v23 = vsel %vm952_vm6, %v944_v9, %v956_v13  ;;  %v2497_v8 = vld [vmem:[#allocation13 + $0x3c8] ss:$16 sps:$4 sm:$0xff]  }
 0x2d2   :  { %v907_v19 = vpop.f32.mrf.mxu1  ;;  %v948_v20 = vpop.f32.mrf.mxu0  ;;  %vm953_vm8 = vcmp.gt.f32.partialorder %v946_v15, 0.0  ;;  %v957_v22 = vmul.f32 0.2, %v946_v15  ;;  %v2827_v28 = vpack.c.bf16 %v958_v21, %v958_v21  ;;  %v2829_v31 = vpack.c.bf16 %v960_v23, %v960_v23  ;;  %v2502_v9 = vld [vmem:[#allocation13 + $0x1ac] ss:$16 sps:$4 sm:$0xff]  }
 0x2d3   :  { %v959_v24 = vsel %vm951_vm7, %v905_v14, %v955_v18  ;;  %v2505_v10 = vld [vmem:[#allocation13 + $0x3ac] ss:$16 sps:$4 sm:$0xff]   ;;  %v2500_v11 = vld [vmem:[#allocation13 + $0x1a8] ss:$16 sps:$4 sm:$0xff]  }
 0x2d4   :  { %v963_v25 = vpack.c.bf16 %v959_v24, %v959_v24  ;;  %v961_v26 = vsel %vm953_vm8, %v946_v15, %v957_v22  ;;  %v2503_v12 = vld [vmem:[#allocation13 + $0x3a8] ss:$16 sps:$4 sm:$0xff]   ;;  %v2508_v13 = vld [vmem:[#allocation13 + $0x18c] ss:$16 sps:$4 sm:$0xff]  }
 0x2d5   :  { %v965_v29 = vpack.c.bf16 %v961_v26, %v961_v26  ;;  %v2511_v14 = vld [vmem:[#allocation13 + $0x38c] ss:$16 sps:$4 sm:$0xff]   ;;  %v2506_v15 = vld [vmem:[#allocation13 + $0x188] ss:$16 sps:$4 sm:$0xff]  }
 0x2d6   :  { %1788 = vmatprep.mubr.bf16.mxu1 %v963_v25  ;;  %v2509_v16 = vld [vmem:[#allocation13 + $0x388] ss:$16 sps:$4 sm:$0xff]   ;;  %v2514_v17 = vld [vmem:[#allocation13 + $0x16c] ss:$16 sps:$4 sm:$0xff]  }
 0x2d7   :  { %1829 = vmatprep.mubr.bf16.mxu0 %v965_v29  ;;  %1789 = vmatmul.mubr.bf16.vlgmr.msra.gmra.mxu1 %v2827_v28  ;;  %v2517_v18 = vld [vmem:[#allocation13 + $0x36c] ss:$16 sps:$4 sm:$0xff]   ;;  %v2512_v19 = vld [vmem:[#allocation13 + $0x168] ss:$16 sps:$4 sm:$0xff]  }
 0x2d8   :  { %1830 = vmatmul.mubr.bf16.vlgmr.msra.gmra.mxu0 %v2829_v31  ;;  %1839 = vmatpush1.bf16.msra.mxu1 %v2440_v27  ;;  %v2515_v20 = vld [vmem:[#allocation13 + $0x368] ss:$16 sps:$4 sm:$0xff]   ;;  %v2520_v21 = vld [vmem:[#allocation13 + $0x14c] ss:$16 sps:$4 sm:$0xff]  }
 0x2d9   :  { %1880 = vmatpush1.bf16.msra.mxu0 %v2443_v30  ;;  %1870 = vmatprep.mubr.bf16.mxu1 %v963_v25  ;;  %v2523_v22 = vld [vmem:[#allocation13 + $0x34c] ss:$16 sps:$4 sm:$0xff]   ;;  %v2518_v23 = vld [vmem:[#allocation13 + $0x148] ss:$16 sps:$4 sm:$0xff]  }
 0x2da   :  { %1911 = vmatprep.mubr.bf16.mxu0 %v965_v29  ;;  %1840 = vmatprep.subr.bf16.mxu1 %v2448_v32  ;;  %v2521_v24 = vld [vmem:[#allocation13 + $0x348] ss:$16 sps:$4 sm:$0xff]   ;;  %v2526_v25 = vld [vmem:[#allocation13 + $0x12c] ss:$16 sps:$4 sm:$0xff]  }
 0x2db   :  { %1881 = vmatprep.subr.bf16.mxu0 %v2451_v33  ;;  %v2529_v26 = vld [vmem:[#allocation13 + $0x32c] ss:$16 sps:$4 sm:$0xff]   ;;  %v2524_v27 = vld [vmem:[#allocation13 + $0x128] ss:$16 sps:$4 sm:$0xff]  }
 0x2dc   :  { %1841 = vmatpush1.bf16.msra.mxu1 %v2446_v34  ;;  %v2527_v29 = vld [vmem:[#allocation13 + $0x328] ss:$16 sps:$4 sm:$0xff]   ;;  %v2532_v30 = vld [vmem:[#allocation13 + $0x10c] ss:$16 sps:$4 sm:$0xff]  }
 0x2dd   :  { %1882 = vmatpush1.bf16.msra.mxu0 %v2449_v35  ;;  %1842 = vmatprep.subr.bf16.mxu1 %v2454_v36  ;;  %v2535_v32 = vld [vmem:[#allocation13 + $0x30c] ss:$16 sps:$4 sm:$0xff]   ;;  %v2530_v33 = vld [vmem:[#allocation13 + $0x108] ss:$16 sps:$4 sm:$0xff]   ;;  %v1094_v35 = vld [vmem:[%s2854_s7 + $0x6] sm:$0xf] }
 0x2de   :  { %1883 = vmatprep.subr.bf16.mxu0 %v2457_v37  ;;  %v2533_v34 = vld [vmem:[#allocation13 + $0x308] ss:$16 sps:$4 sm:$0xff]   ;;  %v1099_v36 = vrot.slane %v1094_v35, %v2806_v43  ;;  %v1103_v37 = vrot.slane %v1094_v35, %v2812_v45  ;;  %v1107_v43 = vrot.slane %v1094_v35, %v538_v63  ;;  %v1111_v45 = vrot.slane %v1094_v35, %v542_v1  ;;  %s2730_s7 = smov [#allocation14]  }
 0x2df   :  { %s1934_s22 = sshll.u32 %s2730_s7, 4  ;;  %s1935_s22 = int_to_ptr.vmem [resolvable:$true] %s1934_s22 }
 0x2e0   :  { %1843 = vmatpush1.bf16.msra.mxu1 %v2452_v38  ;;  %s2684_s3 = scalar_lea.vmem %s1935_s22, 512  ;;  %p2689_p8 = scmp.lt.s32.totalorder %s1935_s22, %s1935_s22 }
 0x2e1   :  { %1884 = vmatpush1.bf16.msra.mxu0 %v2455_v39  ;;  %1844 = vmatprep.subr.bf16.mxu1 %v2460_v40  ;;  %p2685_p7 = scmp.ne.s32.totalorder %s1935_s22, %s2684_s3  ;;  %p2690_p9 = scmp.lt.s32.totalorder %s2684_s3, %s2684_s3 }
 0x2e2   :  { %1885 = vmatprep.subr.bf16.mxu0 %v2463_v41 }
 0x2e3   :  { %p2691_p10 = por %p2690_p9, %p2689_p8 }
 0x2e4   :  { %1845 = vmatpush1.bf16.msra.mxu1 %v2458_v44 }
 0x2e5   :  { %1886 = vmatpush1.bf16.msra.mxu0 %v2461_v46  ;;  %1846 = vmatprep.subr.bf16.mxu1 %v2466_v47  ;;  %p2692_p11 = pnand %p2691_p10, %p2685_p7 }
 0x2e6   :  { %1887 = vmatprep.subr.bf16.mxu0 %v2469_v48 }
 0x2e8   :  { %1847 = vmatpush1.bf16.msra.mxu1 %v2464_v49 }
 0x2e9   :  { %1888 = vmatpush1.bf16.msra.mxu0 %v2467_v50  ;;  %1848 = vmatprep.subr.bf16.mxu1 %v2472_v51 }
 0x2ea   :  { %1889 = vmatprep.subr.bf16.mxu0 %v2475_v52 }
 0x2ec   :  { %1849 = vmatpush1.bf16.msra.mxu1 %v2470_v53 }
 0x2ed   :  { %1890 = vmatpush1.bf16.msra.mxu0 %v2473_v54  ;;  %1850 = vmatprep.subr.bf16.mxu1 %v2478_v55 }
 0x2ee   :  { %1891 = vmatprep.subr.bf16.mxu0 %v2481_v56 }
 0x2f0   :  { %1851 = vmatpush1.bf16.msra.mxu1 %v2476_v57 }
 0x2f1   :  { %1892 = vmatpush1.bf16.msra.mxu0 %v2479_v58  ;;  %1852 = vmatprep.subr.bf16.mxu1 %v2484_v59 }
 0x2f2   :  { %1893 = vmatprep.subr.bf16.mxu0 %v2487_v60 }
 0x2f4   :  { %1853 = vmatpush1.bf16.msra.mxu1 %v2482_v61 }
 0x2f5   :  { %1894 = vmatpush1.bf16.msra.mxu0 %v2485_v62  ;;  %1854 = vmatprep.subr.bf16.mxu1 %v2490_v0 }
 0x2f6   :  { %1895 = vmatprep.subr.bf16.mxu0 %v2493_v2 }
 0x2f8   :  { %1855 = vmatpush2.bf16.msra.mxu1 %v2488_v3 }
 0x2f9   :  { %1896 = vmatpush2.bf16.msra.mxu0 %v2491_v4  ;;  %1856 = vmatprep.subr.bf16.mxu1 %v2496_v5 }
 0x2fa   :  { %1897 = vmatprep.subr.bf16.mxu0 %v2499_v6 }
 0x2fc   :  { %1857 = vmatpush2.bf16.msra.mxu1 %v2494_v7 }
 0x2fd   :  { %1898 = vmatpush2.bf16.msra.mxu0 %v2497_v8  ;;  %1858 = vmatprep.subr.bf16.mxu1 %v2502_v9 }
 0x2fe   :  { %1899 = vmatprep.subr.bf16.mxu0 %v2505_v10 }
 0x300   :  { %1859 = vmatpush2.bf16.msra.mxu1 %v2500_v11 }
 0x301   :  { %1900 = vmatpush2.bf16.msra.mxu0 %v2503_v12  ;;  %1860 = vmatprep.subr.bf16.mxu1 %v2508_v13 }
 0x302   :  { %1901 = vmatprep.subr.bf16.mxu0 %v2511_v14 }
 0x304   :  { %1861 = vmatpush2.bf16.msra.mxu1 %v2506_v15 }
 0x305   :  { %1902 = vmatpush2.bf16.msra.mxu0 %v2509_v16  ;;  %1862 = vmatprep.subr.bf16.mxu1 %v2514_v17 }
 0x306   :  { %1903 = vmatprep.subr.bf16.mxu0 %v2517_v18 }
 0x308   :  { %1863 = vmatpush2.bf16.msra.mxu1 %v2512_v19 }
 0x309   :  { %1904 = vmatpush2.bf16.msra.mxu0 %v2515_v20  ;;  %1864 = vmatprep.subr.bf16.mxu1 %v2520_v21 }
 0x30a   :  { %1905 = vmatprep.subr.bf16.mxu0 %v2523_v22 }
 0x30c   :  { %1865 = vmatpush2.bf16.msra.mxu1 %v2518_v23 }
 0x30d   :  { %1906 = vmatpush2.bf16.msra.mxu0 %v2521_v24  ;;  %1866 = vmatprep.subr.bf16.mxu1 %v2526_v25 }
 0x30e   :  { %1907 = vmatprep.subr.bf16.mxu0 %v2529_v26 }
 0x310   :  { %1867 = vmatpush2.bf16.msra.mxu1 %v2524_v27 }
 0x311   :  { %1908 = vmatpush2.bf16.msra.mxu0 %v2527_v29  ;;  %1868 = vmatprep.subr.bf16.mxu1 %v2532_v30 }
 0x312   :  { %1909 = vmatprep.subr.bf16.mxu0 %v2535_v32 }
 0x314   :  { %1869 = vmatpush2.bf16.msra.mxu1 %v2530_v33 }
 0x315   :  { %1910 = vmatpush2.bf16.msra.mxu0 %v2533_v34 }
 0x317   :  { %1871 = vmatmul.mubr.bf16.vlgmr.msra.gmra.mxu1 %v2827_v28 }
 0x318   :  { %1912 = vmatmul.mubr.bf16.vlgmr.msra.gmra.mxu0 %v2829_v31 }
 0x397   :  { %v1790_v38 = vpop.f32.mrf.mxu1 }
 0x398   :  { %v1791_v39 = vadd.f32 %v1790_v38, %v1099_v36  ;;  %v1831_v40 = vpop.f32.mrf.mxu0 }
 0x399   :  { %v1792_v41 = vpop.f32.mrf.mxu1 }
 0x39a   :  { %v1832_v44 = vadd.f32 %v1831_v40, %v1791_v39  ;;  %v1793_v46 = vadd.f32 %v1792_v41, %v1103_v37  ;;  %v1833_v47 = vpop.f32.mrf.mxu0 }
 0x39b   :  { %v1794_v48 = vpop.f32.mrf.mxu1 }
 0x39c   :  { %2536 = vtanh.f32 %v1832_v44  ;;  %v1834_v28 = vadd.f32 %v1833_v47, %v1793_v46  ;;  %v1835_v49 = vpop.f32.mrf.mxu0 }
 0x39d   :  { %v1795_v31 = vpop.f32.mrf.mxu1 }
 0x39e   :  { %2538 = vtanh.f32 %v1834_v28  ;;  %v1836_v50 = vpop.f32.mrf.mxu0 }
 0x3a9   :  { %v2537_v51 = vpop.eup %2536 }
 0x3aa   :  { %1924 = vst [vmem:[#allocation14] sm:$0xff] %v2537_v51 }
 0x3ab   :  { %v2539_v52 = vpop.eup %2538 }
 0x3ac   :  { %1925 = vst [vmem:[#allocation14 + $0x8] sm:$0xff] %v2539_v52 }
 0x3d7   :  { %v1872_v53 = vpop.f32.mrf.mxu1 }
 0x3d8   :  { %v1873_v54 = vadd.f32 %v1872_v53, %v1107_v43  ;;  %v1913_v55 = vpop.f32.mrf.mxu0 }
 0x3d9   :  { %v1874_v56 = vpop.f32.mrf.mxu1 }
 0x3da   :  { %v1914_v57 = vadd.f32 %v1913_v55, %v1873_v54  ;;  %v1875_v58 = vadd.f32 %v1874_v56, %v1111_v45  ;;  %v1915_v59 = vpop.f32.mrf.mxu0 }
 0x3db   :  { %v1876_v60 = vpop.f32.mrf.mxu1 }
 0x3dc   :  { %2540 = vtanh.f32 %v1914_v57  ;;  %v1916_v61 = vadd.f32 %v1915_v59, %v1875_v58  ;;  %v1917_v62 = vpop.f32.mrf.mxu0 }
 0x3dd   :  { %v1877_v0 = vpop.f32.mrf.mxu1 }
 0x3de   :  { %2542 = vtanh.f32 %v1916_v61  ;;  %v1918_v2 = vpop.f32.mrf.mxu0 }
 0x3e9   :  { %v2541_v63 = vpop.eup %2540 }
 0x3ea   :  { %1926 = vst [vmem:[#allocation14 + $0x10] sm:$0xff] %v2541_v63 }
 0x3eb   :  { %v2543_v42 = vpop.eup %2542 }
 0x3ec   :  { %1927 = vst [vmem:[#allocation14 + $0x18] sm:$0xff] %v2543_v42 }
 0x3ed   :  { %2695 = shalt.err (!%p2692_p11)
}
 0x3ee   :  { %1937 = dma.vmem_to_hbm [thread:$0]  %s1935_s22, 512, %s2855_s8, [#allocation4]  }
 0x3ef   :  { %2712 = dma.done.wait [#allocation4], 512  }
 0x3f0   :  { %2713 = vsyncadd [#allocation4], 4294966784 }
 0x3f1   :  { %1941 = vsyncpa [#allocation3], 1 }
 0x3f2   :  { %1942 = vsyncpa [#allocation6], 1 }
 0x3f3   :  { %1943 = vsyncpa [#allocation9], 1 }
 0x3f4   :  { %1944 = vsyncpa [#allocation12], 1 }
 0x3f5   :  { %1945 = vsyncpa [#allocation4], 1 }

</bundles_post_ra>
